<compile_context>
chip_gen: v6e
topology: v6e:2x2x1
jax: 0.10.0
libtpu: 0.0.40
codegen_flags: <defaults>
</compile_context>

<pallas_src>
import functools

import jax
import jax.numpy as jnp
import numpy as np
from jax.experimental import pallas as pl
from jax.experimental.pallas import tpu as pltpu

EPS = 1e-5


def _make_tap_masks(n, h, w):
    """(9, N*H*W) f32: 1 where tap (ky,kx) reads a valid (non-padding) pixel.

    Flattening order is n-major, then h, then w (matches the (C, N*H*W) layout).
    These masks implement the conv's zero padding and also kill any circular
    wrap-around introduced by the lane roll.
    """
    hh, ww = np.meshgrid(np.arange(h), np.arange(w), indexing="ij")
    hh = np.tile(hh.reshape(-1), n)
    ww = np.tile(ww.reshape(-1), n)
    masks = []
    for ky in range(3):
        for kx in range(3):
            dy, dx = ky - 1, kx - 1
            valid = ((hh + dy >= 0) & (hh + dy < h) &
                     (ww + dx >= 0) & (ww + dx < w))
            masks.append(valid.astype(np.float32))
    return np.stack(masks, axis=0)


def _conv3x3_im2col(src, w2, masks_ref, xcol_ref, img_w):
    """3x3 / stride 1 / pad 1 conv of a (C, N*H*W) slab as one MXU GEMM.

    src      : (C, NHW) f32 value (lane-dense)
    w2       : (Cout, 9*C) weights, columns ordered (tap, ci)
    masks_ref: (9, NHW) per-tap validity masks (implicit zero padding)
    xcol_ref : (9*C, NHW) VMEM scratch for the im2col matrix
    """
    c, nhw = src.shape
    for ky in range(3):
        for kx in range(3):
            t = ky * 3 + kx
            d = (ky - 1) * img_w + (kx - 1)          # flattened source offset
            if d == 0:
                # center tap: no shift, mask is all-ones
                xcol_ref[t * c:(t + 1) * c, :] = src
            else:
                # want shifted[p] = src[p + d]  ->  roll by -d (mod NHW)
                shifted = pltpu.roll(src, shift=(-d) % nhw, axis=1)
                xcol_ref[t * c:(t + 1) * c, :] = shifted * masks_ref[t:t + 1, :]
    return jnp.dot(w2, xcol_ref[...], preferred_element_type=jnp.float32)


def _batchnorm(y, gamma, beta, inv_n):
    """Training-mode BN over the (N*H*W) lane axis: biased variance, eps=1e-5."""
    mean = jnp.sum(y, axis=1, keepdims=True) * inv_n            # (C, 1)
    var = jnp.sum(y * y, axis=1, keepdims=True) * inv_n - mean * mean
    return (y - mean) * jax.lax.rsqrt(var + EPS) * gamma + beta


def _residual_block_kernel(img_w, x_ref, masks_ref, wa_ref, wb_ref,
                           ga_ref, ba_ref, gb_ref, bb_ref, out_ref, xcol_ref):
    # x_ref   : (C, N*H*W)   input, channels on sublanes, flat spatial on lanes
    # masks   : (9, N*H*W)   per-tap validity masks
    # w*_ref  : (C, 9*C)     conv weights repacked for the im2col GEMM
    # g*/b*   : (C, 1)       BN affine
    # out_ref : (C, N*H*W)   lane-dense output slab
    # xcol_ref: (9*C, N*H*W) VMEM scratch, reused by both convs
    _, nhw = x_ref.shape
    inv_n = 1.0 / nhw
    x = x_ref[...]

    # conv_a -> bn_a -> relu
    y = _conv3x3_im2col(x, wa_ref[...], masks_ref, xcol_ref, img_w)
    y = _batchnorm(y, ga_ref[...], ba_ref[...], inv_n)
    y = jnp.maximum(y, 0.0)

    # conv_b -> bn_b
    y = _conv3x3_im2col(y, wb_ref[...], masks_ref, xcol_ref, img_w)
    y = _batchnorm(y, gb_ref[...], bb_ref[...], inv_n)

    # residual add (increase_dim=False: identity shortcut), no final relu
    out_ref[...] = x + y


def residual_block_forward(x_nchw, wa_oihw, wb_oihw, ga, ba, gb, bb):
    """Wrapper: NCHW in, NCHW out (matches the PyTorch module)."""
    n, c, h, w = x_nchw.shape
    nhw = n * h * w

    # lane-dense working layout: (C, N*H*W)
    x_t = jnp.transpose(x_nchw, (1, 0, 2, 3)).reshape(c, nhw).astype(jnp.float32)
    # OIHW -> (O, ky, kx, I) -> (Cout, 9*Cin): column order (tap, ci) matches the
    # im2col rows built in the kernel.
    wa2 = jnp.transpose(wa_oihw, (0, 2, 3, 1)).reshape(c, 9 * c).astype(jnp.float32)
    wb2 = jnp.transpose(wb_oihw, (0, 2, 3, 1)).reshape(c, 9 * c).astype(jnp.float32)
    masks = jnp.asarray(_make_tap_masks(n, h, w))

    out_flat = pl.pallas_call(
        functools.partial(_residual_block_kernel, w),
        out_shape=jax.ShapeDtypeStruct((c, nhw), jnp.float32),
        in_specs=[pl.BlockSpec(memory_space=pltpu.MemorySpace.VMEM)] * 8,
        out_specs=pl.BlockSpec(memory_space=pltpu.MemorySpace.VMEM),
        scratch_shapes=[pltpu.VMEM((9 * c, nhw), jnp.float32)],
        compiler_params=pltpu.CompilerParams(vmem_limit_bytes=32 * 1024 * 1024),
    )(x_t, masks, wa2, wb2,
      ga.reshape(c, 1).astype(jnp.float32), ba.reshape(c, 1).astype(jnp.float32),
      gb.reshape(c, 1).astype(jnp.float32), bb.reshape(c, 1).astype(jnp.float32))

    return jnp.transpose(out_flat.reshape(c, n, h, w), (1, 0, 2, 3))


def residual_block_reference(x, wa, wb, ga, ba, gb, bb):
    """Pure-JAX reference of the PyTorch forward (NCHW), for verification."""
    def conv(inp, wgt):
        return jax.lax.conv_general_dilated(
            inp, wgt, window_strides=(1, 1), padding=((1, 1), (1, 1)),
            dimension_numbers=("NCHW", "OIHW", "NCHW"))

    def bn(inp, g, b):
        mean = inp.mean(axis=(0, 2, 3), keepdims=True)
        var = ((inp - mean) ** 2).mean(axis=(0, 2, 3), keepdims=True)
        xhat = (inp - mean) * jax.lax.rsqrt(var + EPS)
        return xhat * g.reshape(1, -1, 1, 1) + b.reshape(1, -1, 1, 1)

    y = jax.nn.relu(bn(conv(x, wa), ga, ba))
    y = bn(conv(y, wb), gb, bb)
    return x + y


if __name__ == "__main__":
    # ResidualBlock(inplanes=4, increase_dim=False, last=False)
    N, C, H, W = 2, 4, 16, 16
    key = jax.random.PRNGKey(0)
    kx, kwa, kwb, kg1, kb1, kg2, kb2 = jax.random.split(key, 7)

    x = jax.random.normal(kx, (N, C, H, W), jnp.float32)
    wa = jax.random.normal(kwa, (C, C, 3, 3), jnp.float32) * 0.2   # conv_a.weight (OIHW)
    wb = jax.random.normal(kwb, (C, C, 3, 3), jnp.float32) * 0.2   # conv_b.weight (OIHW)
    ga = 1.0 + 0.1 * jax.random.normal(kg1, (C,), jnp.float32)     # bn_a gamma
    ba = 0.1 * jax.random.normal(kb1, (C,), jnp.float32)           # bn_a beta
    gb = 1.0 + 0.1 * jax.random.normal(kg2, (C,), jnp.float32)     # bn_b gamma
    bb = 0.1 * jax.random.normal(kb2, (C,), jnp.float32)           # bn_b beta

    out = residual_block_forward(x, wa, wb, ga, ba, gb, bb)
    out = jax.block_until_ready(out)

    ref = residual_block_reference(x, wa, wb, ga, ba, gb, bb)
    assert out.shape == (N, C, H, W)
    err = float(jnp.max(jnp.abs(out - ref)))
    assert err < 1e-3, err

    print("KERNEL_OK")
</pallas_src>

<mosaic_0001>
module attributes {stable_mosaic.version = 11 : i64} {
  func.func @_residual_block_kernel(%arg0: memref<4x512xf32, #tpu.memory_space<vmem>>, %arg1: memref<9x512xf32, #tpu.memory_space<vmem>>, %arg2: memref<4x36xf32, #tpu.memory_space<vmem>>, %arg3: memref<4x36xf32, #tpu.memory_space<vmem>>, %arg4: memref<4x1xf32, #tpu.memory_space<vmem>>, %arg5: memref<4x1xf32, #tpu.memory_space<vmem>>, %arg6: memref<4x1xf32, #tpu.memory_space<vmem>>, %arg7: memref<4x1xf32, #tpu.memory_space<vmem>>, %arg8: memref<4x512xf32, #tpu.memory_space<vmem>>, %arg9: memref<36x512xf32, #tpu.memory_space<vmem>>) attributes {dimension_semantics = [], scalar_prefetch = 0 : i64, scratch_operands = 1 : i64, tpu.core_type = #tpu.core_type<tc>} {
    %c0 = arith.constant 0 : index
    %c0_0 = arith.constant 0 : index
    %0 = vector.load %arg0[%c0, %c0_0] : memref<4x512xf32, #tpu.memory_space<vmem>>, vector<4x512xf32>
    %c0_1 = arith.constant 0 : index
    %c0_2 = arith.constant 0 : index
    %1 = vector.load %arg2[%c0_1, %c0_2] : memref<4x36xf32, #tpu.memory_space<vmem>>, vector<4x36xf32>
    %c17_i32 = arith.constant 17 : i32
    %2 = tpu.dynamic_rotate %0 by %c17_i32 dim 1 : vector<4x512xf32>, i32 -> vector<4x512xf32>
    %c0_3 = arith.constant 0 : index
    %c0_4 = arith.constant 0 : index
    %3 = vector.load %arg1[%c0_3, %c0_4] : memref<9x512xf32, #tpu.memory_space<vmem>>, vector<1x512xf32>
    %4 = vector.broadcast %3 : vector<1x512xf32> to vector<4x512xf32>
    %5 = arith.mulf %2, %4 : vector<4x512xf32>
    %c0_5 = arith.constant 0 : index
    %c0_6 = arith.constant 0 : index
    %6 = vector.load %arg9[%c0_5, %c0_6] : memref<36x512xf32, #tpu.memory_space<vmem>>, vector<4x512xf32>
    tpu.vector_store %arg9[%c0_5, %c0_6], %5 {strides = array<i32>} : memref<36x512xf32, #tpu.memory_space<vmem>>, vector<4x512xf32>,
    %c16_i32 = arith.constant 16 : i32
    %7 = tpu.dynamic_rotate %0 by %c16_i32 dim 1 : vector<4x512xf32>, i32 -> vector<4x512xf32>
    %c1 = arith.constant 1 : index
    %c0_7 = arith.constant 0 : index
    %8 = vector.load %arg1[%c1, %c0_7] : memref<9x512xf32, #tpu.memory_space<vmem>>, vector<1x512xf32>
    %9 = vector.broadcast %8 : vector<1x512xf32> to vector<4x512xf32>
    %10 = arith.mulf %7, %9 : vector<4x512xf32>
    %c4 = arith.constant 4 : index
    %c0_8 = arith.constant 0 : index
    %11 = vector.load %arg9[%c4, %c0_8] : memref<36x512xf32, #tpu.memory_space<vmem>>, vector<4x512xf32>
    tpu.vector_store %arg9[%c4, %c0_8], %10 {strides = array<i32>} : memref<36x512xf32, #tpu.memory_space<vmem>>, vector<4x512xf32>,
    %c15_i32 = arith.constant 15 : i32
    %12 = tpu.dynamic_rotate %0 by %c15_i32 dim 1 : vector<4x512xf32>, i32 -> vector<4x512xf32>
    %c2 = arith.constant 2 : index
    %c0_9 = arith.constant 0 : index
    %13 = vector.load %arg1[%c2, %c0_9] : memref<9x512xf32, #tpu.memory_space<vmem>>, vector<1x512xf32>
    %14 = vector.broadcast %13 : vector<1x512xf32> to vector<4x512xf32>
    %15 = arith.mulf %12, %14 : vector<4x512xf32>
    %c8 = arith.constant 8 : index
    %c0_10 = arith.constant 0 : index
    %16 = vector.load %arg9[%c8, %c0_10] : memref<36x512xf32, #tpu.memory_space<vmem>>, vector<4x512xf32>
    tpu.vector_store %arg9[%c8, %c0_10], %15 {strides = array<i32>} : memref<36x512xf32, #tpu.memory_space<vmem>>, vector<4x512xf32>,
    %c1_i32 = arith.constant 1 : i32
    %17 = tpu.dynamic_rotate %0 by %c1_i32 dim 1 : vector<4x512xf32>, i32 -> vector<4x512xf32>
    %c3 = arith.constant 3 : index
    %c0_11 = arith.constant 0 : index
    %18 = vector.load %arg1[%c3, %c0_11] : memref<9x512xf32, #tpu.memory_space<vmem>>, vector<1x512xf32>
    %19 = vector.broadcast %18 : vector<1x512xf32> to vector<4x512xf32>
    %20 = arith.mulf %17, %19 : vector<4x512xf32>
    %c12 = arith.constant 12 : index
    %c0_12 = arith.constant 0 : index
    %21 = vector.load %arg9[%c12, %c0_12] : memref<36x512xf32, #tpu.memory_space<vmem>>, vector<4x512xf32>
    tpu.vector_store %arg9[%c12, %c0_12], %20 {strides = array<i32>} : memref<36x512xf32, #tpu.memory_space<vmem>>, vector<4x512xf32>,
    %c16 = arith.constant 16 : index
    %c0_13 = arith.constant 0 : index
    %22 = vector.load %arg9[%c16, %c0_13] : memref<36x512xf32, #tpu.memory_space<vmem>>, vector<4x512xf32>
    tpu.vector_store %arg9[%c16, %c0_13], %0 {strides = array<i32>} : memref<36x512xf32, #tpu.memory_space<vmem>>, vector<4x512xf32>,
    %c511_i32 = arith.constant 511 : i32
    %23 = tpu.dynamic_rotate %0 by %c511_i32 dim 1 : vector<4x512xf32>, i32 -> vector<4x512xf32>
    %c5 = arith.constant 5 : index
    %c0_14 = arith.constant 0 : index
    %24 = vector.load %arg1[%c5, %c0_14] : memref<9x512xf32, #tpu.memory_space<vmem>>, vector<1x512xf32>
    %25 = vector.broadcast %24 : vector<1x512xf32> to vector<4x512xf32>
    %26 = arith.mulf %23, %25 : vector<4x512xf32>
    %c20 = arith.constant 20 : index
    %c0_15 = arith.constant 0 : index
    %27 = vector.load %arg9[%c20, %c0_15] : memref<36x512xf32, #tpu.memory_space<vmem>>, vector<4x512xf32>
    tpu.vector_store %arg9[%c20, %c0_15], %26 {strides = array<i32>} : memref<36x512xf32, #tpu.memory_space<vmem>>, vector<4x512xf32>,
    %c497_i32 = arith.constant 497 : i32
    %28 = tpu.dynamic_rotate %0 by %c497_i32 dim 1 : vector<4x512xf32>, i32 -> vector<4x512xf32>
    %c6 = arith.constant 6 : index
    %c0_16 = arith.constant 0 : index
    %29 = vector.load %arg1[%c6, %c0_16] : memref<9x512xf32, #tpu.memory_space<vmem>>, vector<1x512xf32>
    %30 = vector.broadcast %29 : vector<1x512xf32> to vector<4x512xf32>
    %31 = arith.mulf %28, %30 : vector<4x512xf32>
    %c24 = arith.constant 24 : index
    %c0_17 = arith.constant 0 : index
    %32 = vector.load %arg9[%c24, %c0_17] : memref<36x512xf32, #tpu.memory_space<vmem>>, vector<4x512xf32>
    tpu.vector_store %arg9[%c24, %c0_17], %31 {strides = array<i32>} : memref<36x512xf32, #tpu.memory_space<vmem>>, vector<4x512xf32>,
    %c496_i32 = arith.constant 496 : i32
    %33 = tpu.dynamic_rotate %0 by %c496_i32 dim 1 : vector<4x512xf32>, i32 -> vector<4x512xf32>
    %c7 = arith.constant 7 : index
    %c0_18 = arith.constant 0 : index
    %34 = vector.load %arg1[%c7, %c0_18] : memref<9x512xf32, #tpu.memory_space<vmem>>, vector<1x512xf32>
    %35 = vector.broadcast %34 : vector<1x512xf32> to vector<4x512xf32>
    %36 = arith.mulf %33, %35 : vector<4x512xf32>
    %c28 = arith.constant 28 : index
    %c0_19 = arith.constant 0 : index
    %37 = vector.load %arg9[%c28, %c0_19] : memref<36x512xf32, #tpu.memory_space<vmem>>, vector<4x512xf32>
    tpu.vector_store %arg9[%c28, %c0_19], %36 {strides = array<i32>} : memref<36x512xf32, #tpu.memory_space<vmem>>, vector<4x512xf32>,
    %c495_i32 = arith.constant 495 : i32
    %38 = tpu.dynamic_rotate %0 by %c495_i32 dim 1 : vector<4x512xf32>, i32 -> vector<4x512xf32>
    %c8_20 = arith.constant 8 : index
    %c0_21 = arith.constant 0 : index
    %39 = vector.load %arg1[%c8_20, %c0_21] : memref<9x512xf32, #tpu.memory_space<vmem>>, vector<1x512xf32>
    %40 = vector.broadcast %39 : vector<1x512xf32> to vector<4x512xf32>
    %41 = arith.mulf %38, %40 : vector<4x512xf32>
    %c32 = arith.constant 32 : index
    %c0_22 = arith.constant 0 : index
    %42 = vector.load %arg9[%c32, %c0_22] : memref<36x512xf32, #tpu.memory_space<vmem>>, vector<4x512xf32>
    tpu.vector_store %arg9[%c32, %c0_22], %41 {strides = array<i32>} : memref<36x512xf32, #tpu.memory_space<vmem>>, vector<4x512xf32>,
    %c0_23 = arith.constant 0 : index
    %c0_24 = arith.constant 0 : index
    %43 = vector.load %arg9[%c0_23, %c0_24] : memref<36x512xf32, #tpu.memory_space<vmem>>, vector<36x512xf32>
    %cst = arith.constant dense<0.000000e+00> : vector<4x512xf32>
    %44 = tpu.matmul %1, %43, %cst {dimension_numbers = #tpu.dot_dimension_numbers<[1], [0], [0], [1], [0, 0, 1, 1], [], []>} : vector<4x36xf32>, vector<36x512xf32>, vector<4x512xf32> -> vector<4x512xf32>
    %c0_25 = arith.constant 0 : index
    %c0_26 = arith.constant 0 : index
    %45 = vector.load %arg4[%c0_25, %c0_26] : memref<4x1xf32, #tpu.memory_space<vmem>>, vector<4x1xf32>
    %c0_27 = arith.constant 0 : index
    %c0_28 = arith.constant 0 : index
    %46 = vector.load %arg5[%c0_27, %c0_28] : memref<4x1xf32, #tpu.memory_space<vmem>>, vector<4x1xf32>
    %cst_29 = arith.constant dense<0.000000e+00> : vector<4xf32>
    %47 = vector.multi_reduction <add>, %44, %cst_29 [1] : vector<4x512xf32> to vector<4xf32>
    %48 = vector.shape_cast %47 : vector<4xf32> to vector<4x1xf32>
    %cst_30 = arith.constant 0.001953125 : f32
    %49 = vector.broadcast %cst_30 : f32 to vector<4x1xf32>
    %50 = arith.mulf %48, %49 : vector<4x1xf32>
    %51 = arith.mulf %44, %44 : vector<4x512xf32>
    %cst_31 = arith.constant dense<0.000000e+00> : vector<4xf32>
    %52 = vector.multi_reduction <add>, %51, %cst_31 [1] : vector<4x512xf32> to vector<4xf32>
    %53 = vector.shape_cast %52 : vector<4xf32> to vector<4x1xf32>
    %cst_32 = arith.constant 0.001953125 : f32
    %54 = vector.broadcast %cst_32 : f32 to vector<4x1xf32>
    %55 = arith.mulf %53, %54 : vector<4x1xf32>
    %56 = arith.mulf %50, %50 : vector<4x1xf32>
    %57 = arith.subf %55, %56 : vector<4x1xf32>
    %58 = vector.broadcast %50 : vector<4x1xf32> to vector<4x512xf32>
    %59 = arith.subf %44, %58 : vector<4x512xf32>
    %cst_33 = arith.constant 9.99999974E-6 : f32
    %60 = vector.broadcast %cst_33 : f32 to vector<4x1xf32>
    %61 = arith.addf %57, %60 : vector<4x1xf32>
    %62 = math.rsqrt %61 : vector<4x1xf32>
    %63 = vector.broadcast %62 : vector<4x1xf32> to vector<4x512xf32>
    %64 = arith.mulf %59, %63 : vector<4x512xf32>
    %65 = vector.broadcast %45 : vector<4x1xf32> to vector<4x512xf32>
    %66 = arith.mulf %64, %65 : vector<4x512xf32>
    %67 = vector.broadcast %46 : vector<4x1xf32> to vector<4x512xf32>
    %68 = arith.addf %66, %67 : vector<4x512xf32>
    %cst_34 = arith.constant 0.000000e+00 : f32
    %69 = vector.broadcast %cst_34 : f32 to vector<4x512xf32>
    %70 = arith.maximumf %68, %69 : vector<4x512xf32>
    %c0_35 = arith.constant 0 : index
    %c0_36 = arith.constant 0 : index
    %71 = vector.load %arg3[%c0_35, %c0_36] : memref<4x36xf32, #tpu.memory_space<vmem>>, vector<4x36xf32>
    %c17_i32_37 = arith.constant 17 : i32
    %72 = tpu.dynamic_rotate %70 by %c17_i32_37 dim 1 : vector<4x512xf32>, i32 -> vector<4x512xf32>
    %c0_38 = arith.constant 0 : index
    %c0_39 = arith.constant 0 : index
    %73 = vector.load %arg1[%c0_38, %c0_39] : memref<9x512xf32, #tpu.memory_space<vmem>>, vector<1x512xf32>
    %74 = vector.broadcast %73 : vector<1x512xf32> to vector<4x512xf32>
    %75 = arith.mulf %72, %74 : vector<4x512xf32>
    %c0_40 = arith.constant 0 : index
    %c0_41 = arith.constant 0 : index
    %76 = vector.load %arg9[%c0_40, %c0_41] : memref<36x512xf32, #tpu.memory_space<vmem>>, vector<4x512xf32>
    tpu.vector_store %arg9[%c0_40, %c0_41], %75 {strides = array<i32>} : memref<36x512xf32, #tpu.memory_space<vmem>>, vector<4x512xf32>,
    %c16_i32_42 = arith.constant 16 : i32
    %77 = tpu.dynamic_rotate %70 by %c16_i32_42 dim 1 : vector<4x512xf32>, i32 -> vector<4x512xf32>
    %c1_43 = arith.constant 1 : index
    %c0_44 = arith.constant 0 : index
    %78 = vector.load %arg1[%c1_43, %c0_44] : memref<9x512xf32, #tpu.memory_space<vmem>>, vector<1x512xf32>
    %79 = vector.broadcast %78 : vector<1x512xf32> to vector<4x512xf32>
    %80 = arith.mulf %77, %79 : vector<4x512xf32>
    %c4_45 = arith.constant 4 : index
    %c0_46 = arith.constant 0 : index
    %81 = vector.load %arg9[%c4_45, %c0_46] : memref<36x512xf32, #tpu.memory_space<vmem>>, vector<4x512xf32>
    tpu.vector_store %arg9[%c4_45, %c0_46], %80 {strides = array<i32>} : memref<36x512xf32, #tpu.memory_space<vmem>>, vector<4x512xf32>,
    %c15_i32_47 = arith.constant 15 : i32
    %82 = tpu.dynamic_rotate %70 by %c15_i32_47 dim 1 : vector<4x512xf32>, i32 -> vector<4x512xf32>
    %c2_48 = arith.constant 2 : index
    %c0_49 = arith.constant 0 : index
    %83 = vector.load %arg1[%c2_48, %c0_49] : memref<9x512xf32, #tpu.memory_space<vmem>>, vector<1x512xf32>
    %84 = vector.broadcast %83 : vector<1x512xf32> to vector<4x512xf32>
    %85 = arith.mulf %82, %84 : vector<4x512xf32>
    %c8_50 = arith.constant 8 : index
    %c0_51 = arith.constant 0 : index
    %86 = vector.load %arg9[%c8_50, %c0_51] : memref<36x512xf32, #tpu.memory_space<vmem>>, vector<4x512xf32>
    tpu.vector_store %arg9[%c8_50, %c0_51], %85 {strides = array<i32>} : memref<36x512xf32, #tpu.memory_space<vmem>>, vector<4x512xf32>,
    %c1_i32_52 = arith.constant 1 : i32
    %87 = tpu.dynamic_rotate %70 by %c1_i32_52 dim 1 : vector<4x512xf32>, i32 -> vector<4x512xf32>
    %c3_53 = arith.constant 3 : index
    %c0_54 = arith.constant 0 : index
    %88 = vector.load %arg1[%c3_53, %c0_54] : memref<9x512xf32, #tpu.memory_space<vmem>>, vector<1x512xf32>
    %89 = vector.broadcast %88 : vector<1x512xf32> to vector<4x512xf32>
    %90 = arith.mulf %87, %89 : vector<4x512xf32>
    %c12_55 = arith.constant 12 : index
    %c0_56 = arith.constant 0 : index
    %91 = vector.load %arg9[%c12_55, %c0_56] : memref<36x512xf32, #tpu.memory_space<vmem>>, vector<4x512xf32>
    tpu.vector_store %arg9[%c12_55, %c0_56], %90 {strides = array<i32>} : memref<36x512xf32, #tpu.memory_space<vmem>>, vector<4x512xf32>,
    %c16_57 = arith.constant 16 : index
    %c0_58 = arith.constant 0 : index
    %92 = vector.load %arg9[%c16_57, %c0_58] : memref<36x512xf32, #tpu.memory_space<vmem>>, vector<4x512xf32>
    tpu.vector_store %arg9[%c16_57, %c0_58], %70 {strides = array<i32>} : memref<36x512xf32, #tpu.memory_space<vmem>>, vector<4x512xf32>,
    %c511_i32_59 = arith.constant 511 : i32
    %93 = tpu.dynamic_rotate %70 by %c511_i32_59 dim 1 : vector<4x512xf32>, i32 -> vector<4x512xf32>
    %c5_60 = arith.constant 5 : index
    %c0_61 = arith.constant 0 : index
    %94 = vector.load %arg1[%c5_60, %c0_61] : memref<9x512xf32, #tpu.memory_space<vmem>>, vector<1x512xf32>
    %95 = vector.broadcast %94 : vector<1x512xf32> to vector<4x512xf32>
    %96 = arith.mulf %93, %95 : vector<4x512xf32>
    %c20_62 = arith.constant 20 : index
    %c0_63 = arith.constant 0 : index
    %97 = vector.load %arg9[%c20_62, %c0_63] : memref<36x512xf32, #tpu.memory_space<vmem>>, vector<4x512xf32>
    tpu.vector_store %arg9[%c20_62, %c0_63], %96 {strides = array<i32>} : memref<36x512xf32, #tpu.memory_space<vmem>>, vector<4x512xf32>,
    %c497_i32_64 = arith.constant 497 : i32
    %98 = tpu.dynamic_rotate %70 by %c497_i32_64 dim 1 : vector<4x512xf32>, i32 -> vector<4x512xf32>
    %c6_65 = arith.constant 6 : index
    %c0_66 = arith.constant 0 : index
    %99 = vector.load %arg1[%c6_65, %c0_66] : memref<9x512xf32, #tpu.memory_space<vmem>>, vector<1x512xf32>
    %100 = vector.broadcast %99 : vector<1x512xf32> to vector<4x512xf32>
    %101 = arith.mulf %98, %100 : vector<4x512xf32>
    %c24_67 = arith.constant 24 : index
    %c0_68 = arith.constant 0 : index
    %102 = vector.load %arg9[%c24_67, %c0_68] : memref<36x512xf32, #tpu.memory_space<vmem>>, vector<4x512xf32>
    tpu.vector_store %arg9[%c24_67, %c0_68], %101 {strides = array<i32>} : memref<36x512xf32, #tpu.memory_space<vmem>>, vector<4x512xf32>,
    %c496_i32_69 = arith.constant 496 : i32
    %103 = tpu.dynamic_rotate %70 by %c496_i32_69 dim 1 : vector<4x512xf32>, i32 -> vector<4x512xf32>
    %c7_70 = arith.constant 7 : index
    %c0_71 = arith.constant 0 : index
    %104 = vector.load %arg1[%c7_70, %c0_71] : memref<9x512xf32, #tpu.memory_space<vmem>>, vector<1x512xf32>
    %105 = vector.broadcast %104 : vector<1x512xf32> to vector<4x512xf32>
    %106 = arith.mulf %103, %105 : vector<4x512xf32>
    %c28_72 = arith.constant 28 : index
    %c0_73 = arith.constant 0 : index
    %107 = vector.load %arg9[%c28_72, %c0_73] : memref<36x512xf32, #tpu.memory_space<vmem>>, vector<4x512xf32>
    tpu.vector_store %arg9[%c28_72, %c0_73], %106 {strides = array<i32>} : memref<36x512xf32, #tpu.memory_space<vmem>>, vector<4x512xf32>,
    %c495_i32_74 = arith.constant 495 : i32
    %108 = tpu.dynamic_rotate %70 by %c495_i32_74 dim 1 : vector<4x512xf32>, i32 -> vector<4x512xf32>
    %c8_75 = arith.constant 8 : index
    %c0_76 = arith.constant 0 : index
    %109 = vector.load %arg1[%c8_75, %c0_76] : memref<9x512xf32, #tpu.memory_space<vmem>>, vector<1x512xf32>
    %110 = vector.broadcast %109 : vector<1x512xf32> to vector<4x512xf32>
    %111 = arith.mulf %108, %110 : vector<4x512xf32>
    %c32_77 = arith.constant 32 : index
    %c0_78 = arith.constant 0 : index
    %112 = vector.load %arg9[%c32_77, %c0_78] : memref<36x512xf32, #tpu.memory_space<vmem>>, vector<4x512xf32>
    tpu.vector_store %arg9[%c32_77, %c0_78], %111 {strides = array<i32>} : memref<36x512xf32, #tpu.memory_space<vmem>>, vector<4x512xf32>,
    %c0_79 = arith.constant 0 : index
    %c0_80 = arith.constant 0 : index
    %113 = vector.load %arg9[%c0_79, %c0_80] : memref<36x512xf32, #tpu.memory_space<vmem>>, vector<36x512xf32>
    %cst_81 = arith.constant dense<0.000000e+00> : vector<4x512xf32>
    %114 = tpu.matmul %71, %113, %cst_81 {dimension_numbers = #tpu.dot_dimension_numbers<[1], [0], [0], [1], [0, 0, 1, 1], [], []>} : vector<4x36xf32>, vector<36x512xf32>, vector<4x512xf32> -> vector<4x512xf32>
    %c0_82 = arith.constant 0 : index
    %c0_83 = arith.constant 0 : index
    %115 = vector.load %arg6[%c0_82, %c0_83] : memref<4x1xf32, #tpu.memory_space<vmem>>, vector<4x1xf32>
    %c0_84 = arith.constant 0 : index
    %c0_85 = arith.constant 0 : index
    %116 = vector.load %arg7[%c0_84, %c0_85] : memref<4x1xf32, #tpu.memory_space<vmem>>, vector<4x1xf32>
    %cst_86 = arith.constant dense<0.000000e+00> : vector<4xf32>
    %117 = vector.multi_reduction <add>, %114, %cst_86 [1] : vector<4x512xf32> to vector<4xf32>
    %118 = vector.shape_cast %117 : vector<4xf32> to vector<4x1xf32>
    %cst_87 = arith.constant 0.001953125 : f32
    %119 = vector.broadcast %cst_87 : f32 to vector<4x1xf32>
    %120 = arith.mulf %118, %119 : vector<4x1xf32>
    %121 = arith.mulf %114, %114 : vector<4x512xf32>
    %cst_88 = arith.constant dense<0.000000e+00> : vector<4xf32>
    %122 = vector.multi_reduction <add>, %121, %cst_88 [1] : vector<4x512xf32> to vector<4xf32>
    %123 = vector.shape_cast %122 : vector<4xf32> to vector<4x1xf32>
    %cst_89 = arith.constant 0.001953125 : f32
    %124 = vector.broadcast %cst_89 : f32 to vector<4x1xf32>
    %125 = arith.mulf %123, %124 : vector<4x1xf32>
    %126 = arith.mulf %120, %120 : vector<4x1xf32>
    %127 = arith.subf %125, %126 : vector<4x1xf32>
    %128 = vector.broadcast %120 : vector<4x1xf32> to vector<4x512xf32>
    %129 = arith.subf %114, %128 : vector<4x512xf32>
    %cst_90 = arith.constant 9.99999974E-6 : f32
    %130 = vector.broadcast %cst_90 : f32 to vector<4x1xf32>
    %131 = arith.addf %127, %130 : vector<4x1xf32>
    %132 = math.rsqrt %131 : vector<4x1xf32>
    %133 = vector.broadcast %132 : vector<4x1xf32> to vector<4x512xf32>
    %134 = arith.mulf %129, %133 : vector<4x512xf32>
    %135 = vector.broadcast %115 : vector<4x1xf32> to vector<4x512xf32>
    %136 = arith.mulf %134, %135 : vector<4x512xf32>
    %137 = vector.broadcast %116 : vector<4x1xf32> to vector<4x512xf32>
    %138 = arith.addf %136, %137 : vector<4x512xf32>
    %139 = arith.addf %0, %138 : vector<4x512xf32>
    %c0_91 = arith.constant 0 : index
    %c0_92 = arith.constant 0 : index
    %140 = vector.load %arg8[%c0_91, %c0_92] : memref<4x512xf32, #tpu.memory_space<vmem>>, vector<4x512xf32>
    tpu.vector_store %arg8[%c0_91, %c0_92], %139 {strides = array<i32>} : memref<4x512xf32, #tpu.memory_space<vmem>>, vector<4x512xf32>,
    return
  }
}

</mosaic_0001>

<bundles_post_ra>
// kernel: tpu_custom_call.1
= control target key start
LH: loop header
LB: loop body
LE: loop exit
PB: predicated region body
PF: predicated region fallthrough
CT: control target
= control target key end

     0   :  { %13 = vsyncpa [#allocation4], 0  ;;  %s2011_s0 = inlined_call_operand.vmem [shape: f32[4,512], index: 0, kind: input, shape index: {}]   ;;  %s2012_s1 = inlined_call_operand.hbm [shape: f32[9,512], index: 1, kind: input, shape index: {}]   ;;  %s2013_s2 = inlined_call_operand.vmem [shape: f32[4,36], index: 2, kind: input, shape index: {}]   ;;  %s2014_s3 = inlined_call_operand.vmem [shape: f32[4,36], index: 3, kind: input, shape index: {}]   ;;  %s2015_s4 = inlined_call_operand.vmem [shape: f32[4,1], index: 4, kind: input, shape index: {}]   ;;  %s2016_s5 = inlined_call_operand.vmem [shape: f32[4,1], index: 5, kind: input, shape index: {}]   ;;  %s2017_s6 = inlined_call_operand.vmem [shape: f32[4,1], index: 6, kind: input, shape index: {}]   ;;  %s2018_s7 = inlined_call_operand.vmem [shape: f32[4,1], index: 7, kind: input, shape index: {}]   ;;  %s2019_s8 = inlined_call_operand.hbm [shape: f32[4,512], index: 8, kind: output, shape index: {}]  }
   0x1   :  { %14 = vsyncpa [#allocation5], 0  ;;  %s1424_s27 = smov [#allocation3]  }
   0x2   :  { %s22_s28 = sshll.u32 %s1424_s27, 4  ;;  %s23_s28 = int_to_ptr.vmem [resolvable:$true] %s22_s28 }
   0x3   :  { %s1388_s29 = scalar_lea.vmem %s23_s28, 1024  ;;  %p1393_p1 = scmp.lt.s32.totalorder %s23_s28, %s23_s28 }
   0x4   :  { %p1389_p0 = scmp.ne.s32.totalorder %s23_s28, %s1388_s29  ;;  %p1394_p2 = scmp.lt.s32.totalorder %s1388_s29, %s1388_s29 }
   0x6   :  { %p1395_p3 = por %p1394_p2, %p1393_p1 }
   0x8   :  { %p1396_p4 = pnand %p1395_p3, %p1389_p0 }
   0xa   :  { %1399 = shalt.err (!%p1396_p4)
}
   0xb   :  { %s1425_s30 = smov 512   ;;  %s1426_s9 = smov 32  }
   0xc   :  { %28 = dma.hbm_to_vmem [thread:$0]  %s2012_s1, 1024, %s23_s28, [#allocation4], %s1425_s30, %s1425_s30, %s1426_s9  }
   0xd   :  { %1420 = dma.done.wait [#allocation4], 1024  }
   0xe   :  { %1421 = vsyncadd [#allocation4], 4294966272  ;;  %v1489_v0 = vld [vmem:[%s2011_s0 + $0x8] sm:$0xff]  ;;  %v1494_v1 = vld [vmem:[%s2011_s0] sm:$0xff]  ;;  %s1427_s16 = smov 111   ;;  %s1428_s17 = smov 112   ;;  %v61_v5 = vlaneseq }
   0xf   :  { %418 = vrot.lane.b32.xlu1 %v1489_v0, %s1427_s16  ;;  %256 = vst [vmem:[#allocation2 + $0x28] sm:$0xf] %v1489_v0  ;;  %362 = vrot.lane.b32.xlu0 %v1489_v0, %s1428_s17  ;;  %254 = vst [vmem:[#allocation2 + $0x8] sm:$0xf] %v1494_v1  ;;  %v49_v2 = vcombine.high %v1494_v1, %v1494_v1  ;;  %v50_v3 = vcombine.high %v1489_v0, %v1489_v0  ;;  %s1429_s0 = smov 127   ;;  %s1430_s1 = smov 113  }
  0x10   :  { %s1431_s18 = smov 1   ;;  %s1432_s19 = smov 16   ;;  %v1435_v4 = vmov 0.0   ;;  %v71_v6 = vshrl.u32 %v61_v5, 7  ;;  %v1556_v9 = vand.u32 127, %v61_v5  ;;  %vm482_vm4 = vcmask 1043456  }
  0x11   :  { %255 = vst [vmem:[#allocation2 + $0x88] sm:$0xf] %v49_v2  ;;  %257 = vst [vmem:[#allocation2 + $0x40] sm:$0xf] %v50_v3  ;;  %s1433_s20 = smov 15   ;;  %s1434_s21 = smov 17   ;;  %559 = vmatprep.mubr.f32.mxu0 %v1435_v4  ;;  %630 = vmatprep.mubr.f32.mxu1 %v1435_v4 }
  0x12   :  { %v1558_v10 = vsub.s32 0, %v71_v6  ;;  %v1560_v11 = vsub.s32 1, %v71_v6  ;;  %v1562_v12 = vld [vmem:[#allocation3 + $0x20] ss:$8 sm:$0xf]  ;;  %vm422_vm0 = vcmp.lt.s32.totalorder %v1556_v9, 111 }
  0x13   :  { %414 = vrot.lane.b32.xlu1 %v1494_v1, %s1427_s16  ;;  %358 = vrot.lane.b32.xlu0 %v1494_v1, %s1428_s17  ;;  %v1564_v13 = vld [vmem:[#allocation3 + $0x7] ss:$8 sm:$0xf]  ;;  %vm366_vm1 = vcmp.lt.s32.totalorder %v1556_v9, 112  ;;  %vm266_vm2 = vcmp.lt.s32.totalorder %v1556_v9, 127  ;;  %vm322_vm3 = vcmp.lt.s32.totalorder %v1556_v9, 113 }
  0x14   :  { %v1572_v16 = vld [vmem:[#allocation3 + $0x5] ss:$8 sm:$0xf]  ;;  %v433_v17 = vrot.slane %v1562_v12, %v1558_v10  ;;  %v437_v18 = vrot.slane %v1562_v12, %v1560_v11  ;;  %v377_v19 = vrot.slane %v1564_v13, %v1558_v10  ;;  %v381_v20 = vrot.slane %v1564_v13, %v1560_v11  ;;  %v1597_v32 = vld [vmem:[#allocation3 + $0x6] ss:$8 sm:$0xf] }
  0x15   :  { %v281_v23 = vrot.slane %v1572_v16, %v1560_v11  ;;  %v337_v39 = vrot.slane %v1597_v32, %v1560_v11  ;;  %v333_v45 = vrot.slane %v1597_v32, %v1558_v10  ;;  %v277_v46 = vrot.slane %v1572_v16, %v1558_v10  ;;  %v1616_v47 = vld [vmem:[#allocation3 + $0x3] ss:$8 sm:$0xf] }
  0x16   :  { %v1623_v52 = vsub.s32 2, %v71_v6  ;;  %v1625_v53 = vsub.s32 3, %v71_v6  ;;  %vm206_vm5 = vcmp.lt.s32.totalorder %v1556_v9, 1  ;;  %v221_v58 = vrot.slane %v1616_v47, %v1560_v11 }
  0x17   :  { %416 = vrot.lane.b32.xlu1 %v49_v2, %s1427_s16  ;;  %360 = vrot.lane.b32.xlu0 %v49_v2, %s1428_s17  ;;  %vm106_vm6 = vcmp.lt.s32.totalorder %v1556_v9, 16  ;;  %vm162_vm7 = vcmp.lt.s32.totalorder %v1556_v9, 15  ;;  %vm63_vm8 = vcmp.lt.s32.totalorder %v1556_v9, 17  ;;  %vm478_vm9 = vcmask 293888  }
  0x18   :  { %v441_v63 = vrot.slane %v1562_v12, %v1623_v52  ;;  %v385_v5 = vrot.slane %v1564_v13, %v1623_v52  ;;  %v389_v6 = vrot.slane %v1564_v13, %v1625_v53 }
  0x1b   :  { %262 = vrot.lane.b32.xlu1 %v1489_v0, %s1429_s0  ;;  %260 = vrot.lane.b32.xlu0 %v49_v2, %s1429_s0 }
  0x1f   :  { %318 = vrot.lane.b32.xlu1 %v1489_v0, %s1430_s1  ;;  %316 = vrot.lane.b32.xlu0 %v49_v2, %s1430_s1 }
  0x23   :  { %314 = vrot.lane.b32.xlu1 %v1494_v1, %s1430_s1  ;;  %258 = vrot.lane.b32.xlu0 %v1494_v1, %s1429_s0 }
  0x27   :  { %200 = vrot.lane.b32.xlu1 %v49_v2, %s1431_s18  ;;  %198 = vrot.lane.b32.xlu0 %v1494_v1, %s1431_s18 }
  0x2b   :  { %420 = vrot.lane.b32.xlu1 %v50_v3, %s1427_s16  ;;  %364 = vrot.lane.b32.xlu0 %v50_v3, %s1428_s17 }
  0x2f   :  { %98 = vrot.lane.b32.xlu1 %v1494_v1, %s1432_s19  ;;  %204 = vrot.lane.b32.xlu0 %v50_v3, %s1431_s18 }
  0x33   :  { %154 = vrot.lane.b32.xlu1 %v1494_v1, %s1433_s20  ;;  %100 = vrot.lane.b32.xlu0 %v49_v2, %s1432_s19 }
  0x37   :  { %264 = vrot.lane.b32.xlu1 %v50_v3, %s1429_s0  ;;  %156 = vrot.lane.b32.xlu0 %v49_v2, %s1433_s20 }
  0x3b   :  { %104 = vrot.lane.b32.xlu1 %v50_v3, %s1432_s19  ;;  %320 = vrot.lane.b32.xlu0 %v50_v3, %s1430_s1 }
  0x3f   :  { %53 = vrot.lane.b32.xlu1 %v1494_v1, %s1434_s21  ;;  %160 = vrot.lane.b32.xlu0 %v50_v3, %s1433_s20 }
  0x43   :  { %202 = vrot.lane.b32.xlu1 %v1489_v0, %s1431_s18  ;;  %55 = vrot.lane.b32.xlu0 %v49_v2, %s1434_s21 }
  0x47   :  { %102 = vrot.lane.b32.xlu1 %v1489_v0, %s1432_s19  ;;  %59 = vrot.lane.b32.xlu0 %v50_v3, %s1434_s21  ;;  %v445_v3 = vrot.slane %v1562_v12, %v1625_v53 }
  0x4b   :  { %57 = vrot.lane.b32.xlu1 %v1489_v0, %s1434_s21  ;;  %158 = vrot.lane.b32.xlu0 %v1489_v0, %s1433_s20 }
  0x81   :  { %v1552_v7 = vpop.permute.xlu1 %418  ;;  %v1554_v8 = vpop.permute.xlu0 %362 }
  0x85   :  { %v1566_v14 = vpop.permute.xlu1 %414  ;;  %v1568_v15 = vpop.permute.xlu0 %358 }
  0x89   :  { %v417_v21 = vpop.permute.xlu1 %416  ;;  %v361_v22 = vpop.permute.xlu0 %360 }
  0x8a   :  { %v424_v24 = vsel %vm422_vm0, %v417_v21, %v1552_v7  ;;  %v425_v25 = vsel %vm422_vm0, %v1566_v14, %v417_v21  ;;  %v368_v26 = vsel %vm366_vm1, %v361_v22, %v1554_v8  ;;  %v369_v27 = vsel %vm366_vm1, %v1568_v15, %v361_v22 }
  0x8b   :  { %v450_v28 = vmul.f32 %v433_v17, %v425_v25  ;;  %v451_v29 = vmul.f32 %v437_v18, %v424_v24  ;;  %v394_v30 = vmul.f32 %v377_v19, %v369_v27  ;;  %v395_v31 = vmul.f32 %v381_v20, %v368_v26 }
  0x8c   :  { %v217_v21 = vrot.slane %v1616_v47, %v1558_v10 }
  0x8d   :  { %454 = vst [vmem:[#allocation2 + $0x20] sm:$0xf] %v450_v28  ;;  %455 = vst [vmem:[#allocation2 + $0x48] sm:$0xf] %v451_v29  ;;  %v402_v33 = vrot.slane %v394_v30, 4  ;;  %v403_v34 = vrot.slane %v395_v31, 4  ;;  %v1599_v35 = vpop.permute.xlu1 %262  ;;  %v261_v36 = vpop.permute.xlu0 %260 }
  0x8e   :  { %v268_v37 = vsel %vm266_vm2, %v261_v36, %v1599_v35  ;;  %v1664_v29 = vld [vmem:[#allocation3 + $0x1] ss:$8 sm:$0xf] }
  0x8f   :  { %410 = vst [vmem:[#allocation2 + $0x58] sm:$0xf0] %v402_v33  ;;  %411 = vst [vmem:[#allocation2 + $0x10] sm:$0xf0] %v403_v34  ;;  %v295_v38 = vmul.f32 %v281_v23, %v268_v37 }
  0x90   :  { %v1674_v37 = vld [vmem:[#allocation3 + $0x2] ss:$8 sm:$0xf] }
  0x91   :  { %v303_v40 = vrot.slane %v295_v38, 4  ;;  %v1607_v41 = vpop.permute.xlu1 %318  ;;  %v317_v42 = vpop.permute.xlu0 %316 }
  0x92   :  { %v324_v43 = vsel %vm322_vm3, %v317_v42, %v1607_v41 }
  0x93   :  { %311 = vst [vmem:[#allocation2 + $0x88] sm:$0xf0] %v303_v40  ;;  %v351_v44 = vmul.f32 %v337_v39, %v324_v43  ;;  %v285_v43 = vrot.slane %v1572_v16, %v1623_v52 }
  0x94   :  { %v475_v48 = vld [vmem:[#allocation2 + $0x48] sm:$0xf]  ;;  %v474_v49 = vld [vmem:[#allocation2 + $0x20] sm:$0xf] }
  0x95   :  { %355 = vst [vmem:[#allocation2 + $0x10] sm:$0xf] %v351_v44  ;;  %1346 = vmatprep.subr.msk.mxu0 %vm482_vm4, %v475_v48  ;;  %v1619_v50 = vpop.permute.xlu1 %314  ;;  %v1621_v51 = vpop.permute.xlu0 %258 }
  0x96   :  { %v325_v54 = vsel %vm322_vm3, %v1619_v50, %v317_v42  ;;  %v269_v55 = vsel %vm266_vm2, %v1621_v51, %v261_v36  ;;  %1347 = vmatpush1.msk.msra.mxu0 %vm482_vm4, %v474_v49  ;;  %v121_v36 = vrot.slane %v1664_v29, %v1560_v11 }
  0x97   :  { %v350_v56 = vmul.f32 %v333_v45, %v325_v54  ;;  %v294_v57 = vmul.f32 %v277_v46, %v269_v55  ;;  %v289_v45 = vrot.slane %v1572_v16, %v1625_v53  ;;  %v177_v46 = vrot.slane %v1674_v37, %v1560_v11 }
  0x99   :  { %354 = vst [vmem:[#allocation2 + $0x58] sm:$0xf] %v350_v56  ;;  %v302_v59 = vrot.slane %v294_v57, 4  ;;  %v1637_v60 = vpop.permute.xlu1 %200  ;;  %v199_v61 = vpop.permute.xlu0 %198  ;;  %v117_v57 = vrot.slane %v1664_v29, %v1558_v10 }
  0x9a   :  { %v209_v62 = vsel %vm206_vm5, %v199_v61, %v1637_v60 }
  0x9b   :  { %310 = vst [vmem:[#allocation2 + $0x8] sm:$0xf0] %v302_v59  ;;  %v235_v2 = vmul.f32 %v221_v58, %v209_v62 }
  0x9c   :  { %v471_v17 = vld [vmem:[#allocation2 + $0x10] sm:$0xff] }
  0x9d   :  { %v243_v18 = vrot.slane %v235_v2, 4  ;;  %v421_v19 = vpop.permute.xlu1 %420  ;;  %519 = vmatprep.subr.mxu0 %v471_v17  ;;  %v365_v20 = vpop.permute.xlu0 %364 }
  0x9e   :  { %v423_v22 = vsel %vm422_vm0, %v1552_v7, %v421_v19  ;;  %v426_v12 = vsel %vm422_vm0, %v421_v19, %v1566_v14  ;;  %v367_v13 = vsel %vm366_vm1, %v1554_v8, %v365_v20  ;;  %v370_v23 = vsel %vm366_vm1, %v365_v20, %v1568_v15  ;;  %v467_v8 = vld [vmem:[#allocation2 + $0x88] sm:$0xff] }
  0x9f   :  { %251 = vst [vmem:[#allocation2 + $0x68] sm:$0xf0] %v243_v18  ;;  %v452_v24 = vmul.f32 %v441_v63, %v423_v22  ;;  %v453_v25 = vmul.f32 %v445_v3, %v426_v12  ;;  %v396_v26 = vmul.f32 %v385_v5, %v367_v13  ;;  %v397_v27 = vmul.f32 %v389_v6, %v370_v23  ;;  %v1717_v12 = vld [vmem:[#allocation3] ss:$8 sm:$0xf] }
  0xa0   :  { %v470_v28 = vld [vmem:[#allocation2 + $0x58] sm:$0xff]  ;;  %v173_v22 = vrot.slane %v1674_v37, %v1558_v10 }
  0xa1   :  { %456 = vst [vmem:[#allocation2 + $0x70] sm:$0xf] %v452_v24  ;;  %457 = vst [vmem:[#allocation2 + $0x90] sm:$0xf] %v453_v25  ;;  %v404_v7 = vrot.slane %v396_v26, 4  ;;  %v405_v14 = vrot.slane %v397_v27, 4  ;;  %v99_v30 = vpop.permute.xlu1 %98  ;;  %520 = vmatpush1.msra.mxu0 %v470_v28  ;;  %v1666_v31 = vpop.permute.xlu0 %204  ;;  %v229_v26 = vrot.slane %v1616_v47, %v1625_v53  ;;  %v77_v27 = vrot.slane %v1717_v12, %v1560_v11 }
  0xa2   :  { %v210_v15 = vsel %vm206_vm5, %v1666_v31, %v199_v61  ;;  %521 = vmatprep.subr.mxu0 %v467_v8  ;;  %v466_v33 = vld [vmem:[#allocation2 + $0x8] sm:$0xff]  ;;  %v341_v61 = vrot.slane %v1597_v32, %v1623_v52 }
  0xa3   :  { %412 = vst [vmem:[#allocation2 + $0x98] sm:$0xf0] %v404_v7  ;;  %413 = vst [vmem:[#allocation2 + $0x60] sm:$0xf0] %v405_v14  ;;  %v234_v34 = vmul.f32 %v217_v21, %v210_v15  ;;  %522 = vmatpush1.msra.mxu0 %v466_v33  ;;  %v129_v33 = vrot.slane %v1664_v29, %v1625_v53 }
  0xa5   :  { %v242_v38 = vrot.slane %v234_v34, 4  ;;  %v155_v39 = vpop.permute.xlu1 %154  ;;  %v1676_v40 = vpop.permute.xlu0 %100 }
  0xa6   :  { %v109_v42 = vsel %vm106_vm6, %v99_v30, %v1676_v40 }
  0xa7   :  { %250 = vst [vmem:[#allocation2 + $0x30] sm:$0xf0] %v242_v38  ;;  %v135_v44 = vmul.f32 %v121_v36, %v109_v42 }
  0xa8   :  { %v477_v48 = vld [vmem:[#allocation2 + $0x90] sm:$0xf] }
  0xa9   :  { %v476_v49 = vld [vmem:[#allocation2 + $0x70] sm:$0xf]  ;;  %v143_v54 = vrot.slane %v135_v44, 4  ;;  %1349 = vmatprep.subr.msk.mxu1 %vm482_vm4, %v477_v48  ;;  %v265_v55 = vpop.permute.xlu1 %264  ;;  %v1689_v56 = vpop.permute.xlu0 %156 }
  0xaa   :  { %v267_v16 = vsel %vm266_vm2, %v1599_v35, %v265_v55  ;;  %v270_v58 = vsel %vm266_vm2, %v265_v55, %v1621_v51  ;;  %v165_v59 = vsel %vm162_vm7, %v155_v39, %v1689_v56  ;;  %1350 = vmatpush1.msk.msra.mxu1 %vm482_vm4, %v476_v49  ;;  %v345_v35 = vrot.slane %v1597_v32, %v1625_v53 }
  0xab   :  { %151 = vst [vmem:[#allocation2 + $0x38] sm:$0xf0] %v143_v54  ;;  %v296_v62 = vmul.f32 %v285_v43, %v267_v16  ;;  %v297_v63 = vmul.f32 %v289_v45, %v270_v58  ;;  %v191_v2 = vmul.f32 %v177_v46, %v165_v59  ;;  %v81_v46 = vrot.slane %v1717_v12, %v1623_v52 }
  0xad   :  { %v304_v3 = vrot.slane %v296_v62, 4  ;;  %v305_v5 = vrot.slane %v297_v63, 4  ;;  %195 = vst [vmem:[#allocation2 + $0x68] sm:$0xf] %v191_v2  ;;  %v105_v51 = vpop.permute.xlu1 %104  ;;  %v321_v6 = vpop.permute.xlu0 %320  ;;  %v185_v62 = vrot.slane %v1674_v37, %v1625_v53 }
  0xae   :  { %v110_v17 = vsel %vm106_vm6, %v105_v51, %v99_v30  ;;  %v323_v18 = vsel %vm322_vm3, %v1607_v41, %v321_v6  ;;  %v326_v19 = vsel %vm322_vm3, %v321_v6, %v1619_v50  ;;  %v225_v50 = vrot.slane %v1616_v47, %v1623_v52 }
  0xaf   :  { %312 = vst [vmem:[#allocation2 + $0x28] sm:$0xf0] %v304_v3  ;;  %313 = vst [vmem:[#allocation2 + $0x40] sm:$0xf0] %v305_v5  ;;  %v134_v20 = vmul.f32 %v117_v57, %v110_v17  ;;  %v352_v32 = vmul.f32 %v341_v61, %v323_v18  ;;  %v353_v21 = vmul.f32 %v345_v35, %v326_v19 }
  0xb0   :  { %v125_v30 = vrot.slane %v1664_v29, %v1623_v52  ;;  %v85_v29 = vrot.slane %v1717_v12, %v1625_v53  ;;  %v181_v57 = vrot.slane %v1674_v37, %v1623_v52 }
  0xb1   :  { %v142_v13 = vrot.slane %v134_v20, 4  ;;  %356 = vst [vmem:[#allocation2 + $0x98] sm:$0xf] %v352_v32  ;;  %357 = vst [vmem:[#allocation2 + $0x60] sm:$0xf] %v353_v21  ;;  %v54_v23 = vpop.permute.xlu1 %53  ;;  %v161_v24 = vpop.permute.xlu0 %160 }
  0xb2   :  { %v166_v41 = vsel %vm162_vm7, %v161_v24, %v155_v39  ;;  %v73_v39 = vrot.slane %v1717_v12, %v1558_v10  ;;  %v46_v21 = vld [vmem:[%s2013_s2] sm:$0xf] }
  0xb3   :  { %150 = vst [vmem:[#allocation2] sm:$0xf0] %v142_v13  ;;  %v190_v25 = vmul.f32 %v173_v22, %v166_v41 }
  0xb4   :  { %v463_v28 = vld [vmem:[#allocation2 + $0x68] sm:$0xff] }
  0xb5   :  { %194 = vst [vmem:[#allocation2 + $0x30] sm:$0xf] %v190_v25  ;;  %v203_v7 = vpop.permute.xlu1 %202  ;;  %v56_v14 = vpop.permute.xlu0 %55  ;;  %523 = vmatprep.subr.mxu0 %v463_v28 }
  0xb6   :  { %v207_v8 = vsel %vm206_vm5, %v203_v7, %v1666_v31  ;;  %v208_v47 = vsel %vm206_vm5, %v1637_v60, %v203_v7  ;;  %v66_v15 = vsel %vm63_vm8, %v54_v23, %v56_v14  ;;  %v469_v55 = vld [vmem:[#allocation2 + $0x40] sm:$0xff]  ;;  %v468_v61 = vld [vmem:[#allocation2 + $0x28] sm:$0xff] }
  0xb7   :  { %v236_v34 = vmul.f32 %v225_v50, %v208_v47  ;;  %v237_v36 = vmul.f32 %v229_v26, %v207_v8  ;;  %v91_v38 = vmul.f32 %v77_v27, %v66_v15 }
  0xb8   :  { %v473_v42 = vld [vmem:[#allocation2 + $0x60] sm:$0xff]  ;;  %v472_v43 = vld [vmem:[#allocation2 + $0x98] sm:$0xff] }
  0xb9   :  { %v244_v44 = vrot.slane %v236_v34, 4  ;;  %v245_v31 = vrot.slane %v237_v36, 4  ;;  %95 = vst [vmem:[#allocation2 + $0x38] sm:$0xf] %v91_v38  ;;  %v103_v45 = vpop.permute.xlu1 %102  ;;  %590 = vmatprep.subr.mxu1 %v473_v42  ;;  %v60_v60 = vpop.permute.xlu0 %59 }
  0xba   :  { %v107_v48 = vsel %vm106_vm6, %v103_v45, %v105_v51  ;;  %v108_v49 = vsel %vm106_vm6, %v1676_v40, %v103_v45  ;;  %v67_v54 = vsel %vm63_vm8, %v60_v60, %v54_v23  ;;  %591 = vmatpush1.msra.mxu1 %v472_v43  ;;  %v638_v45 = vld [vmem:[%s2016_s5] sm:$0xf] }
  0xbb   :  { %252 = vst [vmem:[#allocation2 + $0x78] sm:$0xf0] %v244_v44  ;;  %253 = vst [vmem:[#allocation2 + $0x80] sm:$0xf0] %v245_v31  ;;  %v136_v16 = vmul.f32 %v125_v30, %v108_v49  ;;  %v137_v58 = vmul.f32 %v129_v33, %v107_v48  ;;  %v90_v59 = vmul.f32 %v73_v39, %v67_v54  ;;  %592 = vmatprep.subr.mxu1 %v469_v55 }
  0xbc   :  { %593 = vmatpush1.msra.mxu1 %v468_v61  ;;  %v462_v40 = vld [vmem:[#allocation2 + $0x30] sm:$0xff] }
  0xbd   :  { %v144_v63 = vrot.slane %v136_v16, 4  ;;  %v145_v2 = vrot.slane %v137_v58, 4  ;;  %94 = vst [vmem:[#allocation2] sm:$0xf] %v90_v59  ;;  %v58_v35 = vpop.permute.xlu1 %57  ;;  %v159_v3 = vpop.permute.xlu0 %158  ;;  %524 = vmatpush1.msra.mxu0 %v462_v40 }
  0xbe   :  { %v64_v5 = vsel %vm63_vm8, %v58_v35, %v60_v60  ;;  %v65_v51 = vsel %vm63_vm8, %v56_v14, %v58_v35  ;;  %v163_v6 = vsel %vm162_vm7, %v159_v3, %v161_v24  ;;  %v164_v37 = vsel %vm162_vm7, %v1689_v56, %v159_v3  ;;  %v637_v60 = vld [vmem:[%s2015_s4] sm:$0xf] }
  0xbf   :  { %152 = vst [vmem:[#allocation2 + $0x50] sm:$0xf0] %v144_v63  ;;  %153 = vst [vmem:[#allocation2 + $0x18] sm:$0xf0] %v145_v2  ;;  %v92_v17 = vmul.f32 %v81_v46, %v65_v51  ;;  %v93_v18 = vmul.f32 %v85_v29, %v64_v5  ;;  %v192_v19 = vmul.f32 %v181_v57, %v164_v37  ;;  %v1436_v24 = vmov 0  }
  0xc0   :  { %v193_v20 = vmul.f32 %v185_v62, %v163_v6  ;;  %v459_v32 = vld [vmem:[#allocation2 + $0x38] sm:$0xff]  ;;  %1372 = vset.pattern.permute.xlu0 %v1436_v24  ;;  %1373 = vset.pattern.permute.xlu1 %v1436_v24 }
  0xc1   :  { %96 = vst [vmem:[#allocation2 + $0x50] sm:$0xf] %v92_v17  ;;  %97 = vst [vmem:[#allocation2 + $0x18] sm:$0xf] %v93_v18  ;;  %525 = vmatprep.subr.mxu0 %v459_v32 }
  0xc2   :  { %196 = vst [vmem:[#allocation2 + $0x78] sm:$0xf] %v192_v19  ;;  %197 = vst [vmem:[#allocation2 + $0x80] sm:$0xf] %v193_v20 }
  0xc4   :  { %v458_v22 = vld [vmem:[#allocation2] sm:$0xff] }
  0xc5   :  { %526 = vmatpush1.msra.mxu0 %v458_v22 }
  0xc6   :  { %1348 = vmatmul.mubr.msk.f32.vlgmr.msra.gmra.mxu0 %vm478_vm9, %v46_v21 }
  0xc7   :  { %1185 = vmatprep.mubr.f32.mxu0 %v1435_v4 }
  0xc8   :  { %v461_v13 = vld [vmem:[#allocation2 + $0x18] sm:$0xff]  ;;  %v460_v23 = vld [vmem:[#allocation2 + $0x50] sm:$0xff] }
  0xc9   :  { %v465_v56 = vld [vmem:[#allocation2 + $0x80] sm:$0xff]  ;;  %v464_v12 = vld [vmem:[#allocation2 + $0x78] sm:$0xff] }
  0xca   :  { %594 = vmatprep.subr.mxu1 %v465_v56 }
  0xcb   :  { %595 = vmatpush1.msra.mxu1 %v464_v12 }
  0xcc   :  { %596 = vmatprep.subr.mxu1 %v461_v13  ;;  %v1002_v13 = vld [vmem:[#allocation3 + $0x7] ss:$8 sm:$0xf] }
  0xcd   :  { %597 = vmatpush1.msra.mxu1 %v460_v23 }
  0xce   :  { %1351 = vmatmul.mubr.msk.f32.vlgmr.msra.gmra.mxu1 %vm478_vm9, %v46_v21 }
  0xcf   :  { %1256 = vmatprep.mubr.f32.mxu1 %v1435_v4 }
 0x186   :  { %v561_v41 = vpop.f32.mrf.mxu0 }
 0x187   :  { %v649_v50 = vmul.f32 %v561_v41, %v561_v41  ;;  %v639_v27 = vsel %vm482_vm4, %v561_v41, 0.0 }
 0x188   :  { %v563_v25 = vpop.f32.mrf.mxu0 }
 0x189   :  { %v650_v26 = vmul.f32 %v563_v25, %v563_v25  ;;  %v640_v28 = vsel %vm482_vm4, %v563_v25, 0.0  ;;  %v653_v7 = vsel %vm482_vm4, %v649_v50, 0.0  ;;  %v1820_v50 = vld [vmem:[#allocation3 + $0x5] ss:$8 sm:$0xf] }
 0x18a   :  { %v641_v30 = vadd.f32 %v640_v28, %v639_v27 }
 0x18b   :  { %v654_v14 = vsel %vm482_vm4, %v650_v26, 0.0 }
 0x18c   :  { %v655_v34 = vadd.f32 %v654_v14, %v653_v7  ;;  %v911_v7 = vrot.slane %v1820_v50, %v1558_v10  ;;  %v1828_v14 = vld [vmem:[#allocation3 + $0x20] ss:$8 sm:$0xf] }
 0x18e   :  { %v632_v8 = vpop.f32.mrf.mxu1 }
 0x18f   :  { %v642_v47 = vsel %vm482_vm4, %v632_v8, 0.0  ;;  %v651_v4 = vmul.f32 %v632_v8, %v632_v8 }
 0x190   :  { %v634_v15 = vpop.f32.mrf.mxu1  ;;  %v643_v33 = vadd.f32 %v642_v47, %v641_v30 }
 0x191   :  { %v652_v36 = vmul.f32 %v634_v15, %v634_v15  ;;  %v644_v38 = vsel %vm482_vm4, %v634_v15, 0.0  ;;  %v656_v39 = vsel %vm482_vm4, %v651_v4, 0.0 }
 0x192   :  { %v645_v42 = vadd.f32 %v644_v38, %v643_v33  ;;  %v657_v43 = vadd.f32 %v656_v39, %v655_v34  ;;  %v1065_v33 = vrot.slane %v1828_v14, %v1560_v11 }
 0x193   :  { %v658_v44 = vsel %vm482_vm4, %v652_v36, 0.0 }
 0x194   :  { %646 = vadd.xlane.f32.xlu0 %v645_v42  ;;  %v659_v31 = vadd.f32 %v658_v44, %v657_v43  ;;  %v1015_v43 = vrot.slane %v1002_v13, %v1623_v52  ;;  %v1007_v44 = vrot.slane %v1002_v13, %v1558_v10 }
 0x196   :  { %660 = vadd.xlane.f32.xlu1 %v659_v31  ;;  %v1019_v31 = vrot.slane %v1002_v13, %v1625_v53 }
 0x1a7   :  { %686 = vperm.xlu1 %1373, %v638_v45   ;;  %v1847_v45 = vld [vmem:[#allocation3 + $0x3] ss:$8 sm:$0xf] }
 0x1aa   :  { %677 = vperm.xlu0 %1372, %v637_v60  }
 0x21d   :  { %v647_v46 = vpop.xlane.xlu0 %646 }
 0x21e   :  { %v648_v29 = vmul.f32 0.001953125, %v647_v46 }
 0x21f   :  { %v661_v48 = vpop.xlane.xlu1 %660 }
 0x220   :  { %v662_v49 = vmul.f32 0.001953125, %v661_v48  ;;  %v663_v54 = vmul.f32 %v648_v29, %v648_v29  ;;  %v665_v16 = vsub.f32 %v561_v41, %v648_v29  ;;  %v666_v58 = vsub.f32 %v563_v25, %v648_v29 }
 0x221   :  { %v667_v59 = vsub.f32 %v632_v8, %v648_v29  ;;  %v668_v61 = vsub.f32 %v634_v15, %v648_v29  ;;  %v1011_v41 = vrot.slane %v1002_v13, %v1560_v11 }
 0x222   :  { %v664_v55 = vsub.f32 %v662_v49, %v663_v54  ;;  %v853_v54 = vrot.slane %v1847_v45, %v1558_v10 }
 0x223   :  { %v687_v5 = vpop.permute.xlu1 %686 }
 0x224   :  { %v669_v57 = vadd.f32 1e-05, %v664_v55 }
 0x225   :  { %v678_v40 = vpop.permute.xlu0 %677 }
 0x226   :  { %1376 = vrsqrt.f32 %v669_v57 }
 0x233   :  { %v1377_v62 = vpop.eup %1376 }
 0x234   :  { %v671_v63 = vmul.f32 %v1377_v62, %v665_v16  ;;  %v672_v2 = vmul.f32 %v1377_v62, %v666_v58  ;;  %v673_v35 = vmul.f32 %v1377_v62, %v667_v59  ;;  %v674_v3 = vmul.f32 %v1377_v62, %v668_v61 }
 0x235   :  { %v1061_v58 = vrot.slane %v1828_v14, %v1558_v10 }
 0x236   :  { %v680_v51 = vmul.f32 %v678_v40, %v671_v63  ;;  %v681_v6 = vmul.f32 %v678_v40, %v672_v2  ;;  %v682_v37 = vmul.f32 %v678_v40, %v673_v35  ;;  %v683_v17 = vmul.f32 %v678_v40, %v674_v3 }
 0x238   :  { %v689_v18 = vadd.f32 %v687_v5, %v680_v51  ;;  %v690_v19 = vadd.f32 %v687_v5, %v681_v6  ;;  %v691_v20 = vadd.f32 %v687_v5, %v682_v37  ;;  %v692_v32 = vadd.f32 %v687_v5, %v683_v17  ;;  %v960_v37 = vld [vmem:[#allocation3 + $0x6] ss:$8 sm:$0xf] }
 0x239   :  { %v915_v51 = vrot.slane %v1820_v50, %v1560_v11 }
 0x23a   :  { %v693_v21 = vmax.f32 %v689_v18, 0.0  ;;  %v694_v22 = vmax.f32 %v690_v19, 0.0  ;;  %v695_v56 = vmax.f32 %v691_v20, 0.0  ;;  %v696_v12 = vmax.f32 %v692_v32, 0.0 }
 0x23c   :  { %890 = vst [vmem:[#allocation2 + $0x8] sm:$0xf] %v693_v21  ;;  %891 = vst [vmem:[#allocation2 + $0x88] sm:$0xf] %v694_v22  ;;  %896 = vrot.lane.b32.xlu0 %v694_v22, %s1429_s0  ;;  %992 = vrot.lane.b32.xlu1 %v694_v22, %s1428_s17 }
 0x23d   :  { %892 = vst [vmem:[#allocation2 + $0x28] sm:$0xf] %v695_v56  ;;  %893 = vst [vmem:[#allocation2 + $0x40] sm:$0xf] %v696_v12 }
 0x240   :  { %950 = vrot.lane.b32.xlu0 %v694_v22, %s1430_s1  ;;  %994 = vrot.lane.b32.xlu1 %v695_v56, %s1428_s17 }
 0x244   :  { %1046 = vrot.lane.b32.xlu1 %v694_v22, %s1427_s16  ;;  %894 = vrot.lane.b32.xlu0 %v693_v21, %s1429_s0 }
 0x248   :  { %1048 = vrot.lane.b32.xlu1 %v695_v56, %s1427_s16  ;;  %836 = vrot.lane.b32.xlu0 %v693_v21, %s1431_s18 }
 0x24c   :  { %996 = vrot.lane.b32.xlu0 %v696_v12, %s1428_s17  ;;  %990 = vrot.lane.b32.xlu1 %v693_v21, %s1428_s17 }
 0x250   :  { %842 = vrot.lane.b32.xlu0 %v696_v12, %s1431_s18  ;;  %1044 = vrot.lane.b32.xlu1 %v693_v21, %s1427_s16 }
 0x254   :  { %742 = vrot.lane.b32.xlu0 %v694_v22, %s1432_s19  ;;  %898 = vrot.lane.b32.xlu1 %v695_v56, %s1429_s0 }
 0x258   :  { %796 = vrot.lane.b32.xlu0 %v694_v22, %s1433_s20  ;;  %952 = vrot.lane.b32.xlu1 %v695_v56, %s1430_s1 }
 0x25c   :  { %954 = vrot.lane.b32.xlu0 %v696_v12, %s1430_s1  ;;  %948 = vrot.lane.b32.xlu1 %v693_v21, %s1430_s1 }
 0x260   :  { %800 = vrot.lane.b32.xlu0 %v696_v12, %s1433_s20  ;;  %838 = vrot.lane.b32.xlu1 %v694_v22, %s1431_s18 }
 0x264   :  { %700 = vrot.lane.b32.xlu0 %v694_v22, %s1434_s21  ;;  %1050 = vrot.lane.b32.xlu1 %v696_v12, %s1427_s16 }
 0x268   :  { %704 = vrot.lane.b32.xlu0 %v696_v12, %s1434_s21  ;;  %740 = vrot.lane.b32.xlu1 %v693_v21, %s1432_s19 }
 0x26c   :  { %798 = vrot.lane.b32.xlu0 %v695_v56, %s1433_s20  ;;  %794 = vrot.lane.b32.xlu1 %v693_v21, %s1433_s20 }
 0x270   :  { %900 = vrot.lane.b32.xlu1 %v696_v12, %s1429_s0 }
 0x274   :  { %746 = vrot.lane.b32.xlu1 %v696_v12, %s1432_s19 }
 0x278   :  { %698 = vrot.lane.b32.xlu1 %v693_v21, %s1434_s21  ;;  %v969_v21 = vrot.slane %v960_v37, %v1560_v11 }
 0x27c   :  { %840 = vrot.lane.b32.xlu1 %v695_v56, %s1431_s18 }
 0x280   :  { %744 = vrot.lane.b32.xlu1 %v695_v56, %s1432_s19 }
 0x284   :  { %702 = vrot.lane.b32.xlu1 %v695_v56, %s1434_s21 }
 0x2ae   :  { %v897_v23 = vpop.permute.xlu0 %896  ;;  %v993_v24 = vpop.permute.xlu1 %992 }
 0x2b2   :  { %v1822_v25 = vpop.permute.xlu0 %950  ;;  %v995_v26 = vpop.permute.xlu1 %994 }
 0x2b3   :  { %v999_v27 = vsel %vm366_vm1, %v993_v24, %v995_v26 }
 0x2b4   :  { %v1025_v28 = vmul.f32 %v1011_v41, %v999_v27  ;;  %v973_v41 = vrot.slane %v960_v37, %v1623_v52 }
 0x2b6   :  { %v1033_v30 = vrot.slane %v1025_v28, 4  ;;  %v1047_v8 = vpop.permute.xlu1 %1046  ;;  %v1830_v47 = vpop.permute.xlu0 %894 }
 0x2b7   :  { %v904_v4 = vsel %vm266_vm2, %v1830_v47, %v897_v23 }
 0x2b8   :  { %1041 = vst [vmem:[#allocation2 + $0x10] sm:$0xf0] %v1033_v30  ;;  %v928_v15 = vmul.f32 %v911_v7, %v904_v4 }
 0x2ba   :  { %v936_v34 = vrot.slane %v928_v15, 4  ;;  %v1837_v36 = vpop.permute.xlu1 %1048  ;;  %v1839_v38 = vpop.permute.xlu0 %836 }
 0x2bb   :  { %v1053_v39 = vsel %vm422_vm0, %v1047_v8, %v1837_v36 }
 0x2bc   :  { %944 = vst [vmem:[#allocation2 + $0x8] sm:$0xf0] %v936_v34  ;;  %v1079_v42 = vmul.f32 %v1065_v33, %v1053_v39  ;;  %v857_v39 = vrot.slane %v1847_v45, %v1560_v11 }
 0x2be   :  { %1083 = vst [vmem:[#allocation2 + $0x48] sm:$0xf] %v1079_v42  ;;  %v997_v60 = vpop.permute.xlu0 %996  ;;  %v991_v46 = vpop.permute.xlu1 %990 }
 0x2bf   :  { %v998_v29 = vsel %vm366_vm1, %v995_v26, %v997_v60  ;;  %v1000_v48 = vsel %vm366_vm1, %v991_v46, %v993_v24  ;;  %v1001_v49 = vsel %vm366_vm1, %v997_v60, %v991_v46  ;;  %v965_v26 = vrot.slane %v960_v37, %v1558_v10 }
 0x2c0   :  { %v1026_v55 = vmul.f32 %v1015_v43, %v998_v29  ;;  %v1024_v57 = vmul.f32 %v1007_v44, %v1000_v48  ;;  %v1027_v16 = vmul.f32 %v1019_v31, %v1001_v49  ;;  %v1069_v31 = vrot.slane %v1828_v14, %v1623_v52  ;;  %v1906_v29 = vld [vmem:[#allocation3 + $0x1] ss:$8 sm:$0xf] }
 0x2c1   :  { %v1073_v60 = vrot.slane %v1828_v14, %v1625_v53  ;;  %v761_v14 = vrot.slane %v1906_v29, %v1560_v11 }
 0x2c2   :  { %v1034_v59 = vrot.slane %v1026_v55, 4  ;;  %v1032_v61 = vrot.slane %v1024_v57, 4  ;;  %v1035_v62 = vrot.slane %v1027_v16, 4  ;;  %v1859_v40 = vpop.permute.xlu0 %842  ;;  %v1045_v63 = vpop.permute.xlu1 %1044 }
 0x2c3   :  { %v847_v2 = vsel %vm206_vm5, %v1859_v40, %v1839_v38  ;;  %v1054_v35 = vsel %vm422_vm0, %v1045_v63, %v1047_v8 }
 0x2c4   :  { %1042 = vst [vmem:[#allocation2 + $0x98] sm:$0xf0] %v1034_v59  ;;  %1040 = vst [vmem:[#allocation2 + $0x58] sm:$0xf0] %v1032_v61  ;;  %v870_v3 = vmul.f32 %v853_v54, %v847_v2  ;;  %v1078_v5 = vmul.f32 %v1061_v58, %v1054_v35 }
 0x2c5   :  { %1043 = vst [vmem:[#allocation2 + $0x60] sm:$0xf0] %v1035_v62  ;;  %v1103_v6 = vld [vmem:[#allocation2 + $0x48] sm:$0xf] }
 0x2c6   :  { %v878_v17 = vrot.slane %v870_v3, 4  ;;  %1082 = vst [vmem:[#allocation2 + $0x20] sm:$0xf] %v1078_v5  ;;  %1352 = vmatprep.subr.msk.mxu0 %vm482_vm4, %v1103_v6  ;;  %v1870_v18 = vpop.permute.xlu0 %742  ;;  %v1872_v19 = vpop.permute.xlu1 %898  ;;  %v806_v58 = vld [vmem:[#allocation3 + $0x2] ss:$8 sm:$0xf] }
 0x2c7   :  { %v903_v20 = vsel %vm266_vm2, %v897_v23, %v1872_v19  ;;  %v977_v23 = vrot.slane %v960_v37, %v1625_v53  ;;  %v819_v35 = vrot.slane %v806_v58, %v1623_v52  ;;  %v823_v5 = vrot.slane %v806_v58, %v1625_v53 }
 0x2c8   :  { %886 = vst [vmem:[#allocation2 + $0x30] sm:$0xf0] %v878_v17  ;;  %v929_v32 = vmul.f32 %v915_v51, %v903_v20  ;;  %v811_v51 = vrot.slane %v806_v58, %v1558_v10  ;;  %v815_v6 = vrot.slane %v806_v58, %v1560_v11 }
 0x2ca   :  { %v937_v22 = vrot.slane %v929_v32, 4  ;;  %v1878_v56 = vpop.permute.xlu0 %796  ;;  %v953_v12 = vpop.permute.xlu1 %952  ;;  %v919_v32 = vrot.slane %v1820_v50, %v1623_v52 }
 0x2cb   :  { %v957_v13 = vsel %vm322_vm3, %v1822_v25, %v953_v12 }
 0x2cc   :  { %945 = vst [vmem:[#allocation2 + $0x88] sm:$0xf0] %v937_v22  ;;  %v983_v24 = vmul.f32 %v969_v21, %v957_v13  ;;  %v923_v21 = vrot.slane %v1820_v50, %v1625_v53 }
 0x2cd   :  { %v1102_v27 = vld [vmem:[#allocation2 + $0x20] sm:$0xf] }
 0x2ce   :  { %987 = vst [vmem:[#allocation2 + $0x10] sm:$0xf] %v983_v24  ;;  %v955_v28 = vpop.permute.xlu0 %954  ;;  %1353 = vmatpush1.msk.msra.mxu0 %vm482_vm4, %v1102_v27  ;;  %v949_v7 = vpop.permute.xlu1 %948 }
 0x2cf   :  { %v956_v30 = vsel %vm322_vm3, %v953_v12, %v955_v28  ;;  %v958_v8 = vsel %vm322_vm3, %v949_v7, %v1822_v25  ;;  %v959_v4 = vsel %vm322_vm3, %v955_v28, %v949_v7 }
 0x2d0   :  { %v984_v15 = vmul.f32 %v973_v41, %v956_v30  ;;  %v982_v33 = vmul.f32 %v965_v26, %v958_v8  ;;  %v985_v34 = vmul.f32 %v977_v23, %v959_v4 }
 0x2d2   :  { %988 = vst [vmem:[#allocation2 + $0x98] sm:$0xf] %v984_v15  ;;  %986 = vst [vmem:[#allocation2 + $0x58] sm:$0xf] %v982_v33  ;;  %v801_v42 = vpop.permute.xlu0 %800  ;;  %v1896_v43 = vpop.permute.xlu1 %838 }
 0x2d3   :  { %989 = vst [vmem:[#allocation2 + $0x60] sm:$0xf] %v985_v34  ;;  %v846_v25 = vsel %vm206_vm5, %v1839_v38, %v1896_v43  ;;  %v1095_v2 = vld [vmem:[#allocation2 + $0x88] sm:$0xff]  ;;  %v757_v34 = vrot.slane %v1906_v29, %v1558_v10 }
 0x2d4   :  { %v871_v44 = vmul.f32 %v857_v39, %v846_v25  ;;  %v710_v39 = vld [vmem:[#allocation3] ss:$8 sm:$0xf] }
 0x2d5   :  { %v1099_v46 = vld [vmem:[#allocation2 + $0x10] sm:$0xff] }
 0x2d6   :  { %v879_v48 = vrot.slane %v871_v44, 4  ;;  %v1908_v49 = vpop.permute.xlu0 %700  ;;  %1145 = vmatprep.subr.mxu0 %v1099_v46  ;;  %v1051_v54 = vpop.permute.xlu1 %1050 }
 0x2d7   :  { %v1052_v55 = vsel %vm422_vm0, %v1837_v36, %v1051_v54  ;;  %v1055_v38 = vsel %vm422_vm0, %v1051_v54, %v1045_v63  ;;  %v1094_v63 = vld [vmem:[#allocation2 + $0x8] sm:$0xff] }
 0x2d8   :  { %887 = vst [vmem:[#allocation2 + $0x68] sm:$0xf0] %v879_v48  ;;  %v1080_v57 = vmul.f32 %v1069_v31, %v1052_v55  ;;  %v1081_v16 = vmul.f32 %v1073_v60, %v1055_v38  ;;  %v715_v31 = vrot.slane %v710_v39, %v1558_v10  ;;  %v719_v60 = vrot.slane %v710_v39, %v1560_v11 }
 0x2d9   :  { %v1098_v59 = vld [vmem:[#allocation2 + $0x58] sm:$0xff]  ;;  %v861_v10 = vrot.slane %v1847_v45, %v1623_v52  ;;  %v865_v11 = vrot.slane %v1847_v45, %v1625_v53  ;;  %v769_v45 = vrot.slane %v1906_v29, %v1625_v53 }
 0x2da   :  { %1084 = vst [vmem:[#allocation2 + $0x70] sm:$0xf] %v1080_v57  ;;  %1085 = vst [vmem:[#allocation2 + $0x90] sm:$0xf] %v1081_v16  ;;  %v1917_v61 = vpop.permute.xlu0 %704  ;;  %1146 = vmatpush1.msra.mxu0 %v1098_v59  ;;  %v741_v62 = vpop.permute.xlu1 %740  ;;  %v1101_v8 = vld [vmem:[#allocation2 + $0x60] sm:$0xff]  ;;  %v1100_v33 = vld [vmem:[#allocation2 + $0x98] sm:$0xff] }
 0x2db   :  { %v750_v36 = vsel %vm106_vm6, %v741_v62, %v1870_v18  ;;  %1147 = vmatprep.subr.mxu0 %v1095_v2 }
 0x2dc   :  { %v775_v3 = vmul.f32 %v761_v14, %v750_v36  ;;  %1148 = vmatpush1.msra.mxu0 %v1094_v63 }
 0x2de   :  { %v783_v37 = vrot.slane %v775_v3, 4  ;;  %v799_v17 = vpop.permute.xlu0 %798  ;;  %v795_v20 = vpop.permute.xlu1 %794  ;;  %v765_v3 = vrot.slane %v1906_v29, %v1623_v52 }
 0x2df   :  { %v802_v22 = vsel %vm162_vm7, %v799_v17, %v801_v42  ;;  %v803_v12 = vsel %vm162_vm7, %v1878_v56, %v799_v17  ;;  %v804_v13 = vsel %vm162_vm7, %v795_v20, %v1878_v56  ;;  %v805_v24 = vsel %vm162_vm7, %v801_v42, %v795_v20 }
 0x2e0   :  { %791 = vst [vmem:[#allocation2 + $0x38] sm:$0xf0] %v783_v37  ;;  %v830_v41 = vmul.f32 %v819_v35, %v803_v12  ;;  %v831_v26 = vmul.f32 %v823_v5, %v802_v22  ;;  %v828_v23 = vmul.f32 %v811_v51, %v805_v24  ;;  %v829_v27 = vmul.f32 %v815_v6, %v804_v13  ;;  %v697_v22 = vld [vmem:[%s2014_s3] sm:$0xf] }
 0x2e1   :  { %v1105_v50 = vld [vmem:[#allocation2 + $0x90] sm:$0xf]  ;;  %v723_v20 = vrot.slane %v710_v39, %v1623_v52 }
 0x2e2   :  { %v1104_v28 = vld [vmem:[#allocation2 + $0x70] sm:$0xf]  ;;  %834 = vst [vmem:[#allocation2 + $0x78] sm:$0xf] %v830_v41  ;;  %835 = vst [vmem:[#allocation2 + $0x80] sm:$0xf] %v831_v26  ;;  %1355 = vmatprep.subr.msk.mxu1 %vm482_vm4, %v1105_v50  ;;  %v901_v7 = vpop.permute.xlu1 %900 }
 0x2e3   :  { %832 = vst [vmem:[#allocation2 + $0x30] sm:$0xf] %v828_v23  ;;  %833 = vst [vmem:[#allocation2 + $0x68] sm:$0xf] %v829_v27  ;;  %v902_v56 = vsel %vm266_vm2, %v1872_v19, %v901_v7  ;;  %v905_v30 = vsel %vm266_vm2, %v901_v7, %v1830_v47  ;;  %1356 = vmatpush1.msk.msra.mxu1 %vm482_vm4, %v1104_v28 }
 0x2e4   :  { %v930_v4 = vmul.f32 %v919_v32, %v902_v56  ;;  %v931_v15 = vmul.f32 %v923_v21, %v905_v30  ;;  %1216 = vmatprep.subr.mxu1 %v1101_v8  ;;  %v727_v32 = vrot.slane %v710_v39, %v1625_v53 }
 0x2e5   :  { %1217 = vmatpush1.msra.mxu1 %v1100_v33 }
 0x2e6   :  { %v938_v42 = vrot.slane %v930_v4, 4  ;;  %v939_v25 = vrot.slane %v931_v15, 4  ;;  %v747_v44 = vpop.permute.xlu1 %746 }
 0x2e7   :  { %v751_v19 = vsel %vm106_vm6, %v747_v44, %v741_v62 }
 0x2e8   :  { %946 = vst [vmem:[#allocation2 + $0x28] sm:$0xf0] %v938_v42  ;;  %947 = vst [vmem:[#allocation2 + $0x40] sm:$0xf0] %v939_v25  ;;  %v774_v47 = vmul.f32 %v757_v34, %v751_v19 }
 0x2ea   :  { %v1091_v46 = vld [vmem:[#allocation2 + $0x68] sm:$0xff]  ;;  %v1090_v48 = vld [vmem:[#allocation2 + $0x30] sm:$0xff]  ;;  %v782_v54 = vrot.slane %v774_v47, 4  ;;  %v699_v55 = vpop.permute.xlu1 %698 }
 0x2eb   :  { %1149 = vmatprep.subr.mxu0 %v1091_v46  ;;  %v708_v38 = vsel %vm63_vm8, %v699_v55, %v1908_v49  ;;  %v709_v57 = vsel %vm63_vm8, %v1917_v61, %v699_v55  ;;  %v1263_v55 = vld [vmem:[%s2017_s6] sm:$0xf]  ;;  %s1437_s6 = smov [#allocation6]  }
 0x2ec   :  { %1150 = vmatpush1.msra.mxu0 %v1090_v48  ;;  %790 = vst [vmem:[#allocation2] sm:$0xf0] %v782_v54  ;;  %v732_v16 = vmul.f32 %v715_v31, %v709_v57  ;;  %v733_v14 = vmul.f32 %v719_v60, %v708_v38  ;;  %v1264_v54 = vld [vmem:[%s2018_s7] sm:$0xf]  ;;  %s1337_s7 = sshll.u32 %s1437_s6, 4  ;;  %s1338_s7 = int_to_ptr.vmem [resolvable:$true] %s1337_s7 }
 0x2ed   :  { %s1400_s30 = scalar_lea.vmem %s1338_s7, 256  ;;  %p1405_p6 = scmp.lt.s32.totalorder %s1338_s7, %s1338_s7 }
 0x2ee   :  { %736 = vst [vmem:[#allocation2] sm:$0xf] %v732_v16  ;;  %737 = vst [vmem:[#allocation2 + $0x38] sm:$0xf] %v733_v14  ;;  %v841_v58 = vpop.permute.xlu1 %840  ;;  %p1401_p5 = scmp.ne.s32.totalorder %s1338_s7, %s1400_s30  ;;  %p1406_p7 = scmp.lt.s32.totalorder %s1400_s30, %s1400_s30 }
 0x2ef   :  { %v844_v59 = vsel %vm206_vm5, %v841_v58, %v1859_v40  ;;  %v845_v62 = vsel %vm206_vm5, %v1896_v43, %v841_v58  ;;  %v1097_v2 = vld [vmem:[#allocation2 + $0x40] sm:$0xff]  ;;  %v1096_v36 = vld [vmem:[#allocation2 + $0x28] sm:$0xff] }
 0x2f0   :  { %v872_v63 = vmul.f32 %v861_v10, %v845_v62  ;;  %v873_v35 = vmul.f32 %v865_v11, %v844_v59  ;;  %1218 = vmatprep.subr.mxu1 %v1097_v2  ;;  %p1407_p8 = por %p1406_p7, %p1405_p6 }
 0x2f1   :  { %1219 = vmatpush1.msra.mxu1 %v1096_v36 }
 0x2f2   :  { %v880_v5 = vrot.slane %v872_v63, 4  ;;  %v881_v51 = vrot.slane %v873_v35, 4  ;;  %v745_v6 = vpop.permute.xlu1 %744  ;;  %p1408_p9 = pnand %p1407_p8, %p1401_p5 }
 0x2f3   :  { %v748_v40 = vsel %vm106_vm6, %v745_v6, %v747_v44  ;;  %v749_v43 = vsel %vm106_vm6, %v1870_v18, %v745_v6 }
 0x2f4   :  { %888 = vst [vmem:[#allocation2 + $0x78] sm:$0xf0] %v880_v5  ;;  %889 = vst [vmem:[#allocation2 + $0x80] sm:$0xf0] %v881_v51  ;;  %v776_v37 = vmul.f32 %v765_v3, %v749_v43  ;;  %v777_v17 = vmul.f32 %v769_v45, %v748_v40 }
 0x2f5   :  { %v1087_v29 = vld [vmem:[#allocation2 + $0x38] sm:$0xff]  ;;  %v1086_v21 = vld [vmem:[#allocation2] sm:$0xff] }
 0x2f6   :  { %v784_v12 = vrot.slane %v776_v37, 4  ;;  %v785_v13 = vrot.slane %v777_v17, 4  ;;  %v703_v24 = vpop.permute.xlu1 %702  ;;  %1151 = vmatprep.subr.mxu0 %v1087_v29 }
 0x2f7   :  { %v706_v18 = vsel %vm63_vm8, %v703_v24, %v1917_v61  ;;  %v707_v52 = vsel %vm63_vm8, %v1908_v49, %v703_v24  ;;  %1152 = vmatpush1.msra.mxu0 %v1086_v21 }
 0x2f8   :  { %792 = vst [vmem:[#allocation2 + $0x50] sm:$0xf0] %v784_v12  ;;  %793 = vst [vmem:[#allocation2 + $0x18] sm:$0xf0] %v785_v13  ;;  %v734_v53 = vmul.f32 %v723_v20, %v707_v52  ;;  %v735_v41 = vmul.f32 %v727_v32, %v706_v18  ;;  %1354 = vmatmul.mubr.msk.f32.vlgmr.msra.gmra.mxu0 %vm478_vm9, %v697_v22 }
 0x2fa   :  { %738 = vst [vmem:[#allocation2 + $0x50] sm:$0xf] %v734_v53  ;;  %739 = vst [vmem:[#allocation2 + $0x18] sm:$0xf] %v735_v41 }
 0x2fb   :  { %v1093_v26 = vld [vmem:[#allocation2 + $0x80] sm:$0xff]  ;;  %v1092_v23 = vld [vmem:[#allocation2 + $0x78] sm:$0xff] }
 0x2fc   :  { %1220 = vmatprep.subr.mxu1 %v1093_v26 }
 0x2fd   :  { %1221 = vmatpush1.msra.mxu1 %v1092_v23 }
 0x301   :  { %v1089_v27 = vld [vmem:[#allocation2 + $0x18] sm:$0xff]  ;;  %v1088_v50 = vld [vmem:[#allocation2 + $0x50] sm:$0xff] }
 0x302   :  { %1222 = vmatprep.subr.mxu1 %v1089_v27 }
 0x303   :  { %1223 = vmatpush1.msra.mxu1 %v1088_v50 }
 0x304   :  { %1357 = vmatmul.mubr.msk.f32.vlgmr.msra.gmra.mxu1 %vm478_vm9, %v697_v22 }
 0x3b8   :  { %v1187_v9 = vpop.f32.mrf.mxu0 }
 0x3b9   :  { %v1275_v61 = vmul.f32 %v1187_v9, %v1187_v9  ;;  %v1265_v7 = vsel %vm482_vm4, %v1187_v9, 0.0 }
 0x3ba   :  { %v1189_v49 = vpop.f32.mrf.mxu0 }
 0x3bb   :  { %v1276_v28 = vmul.f32 %v1189_v49, %v1189_v49  ;;  %v1266_v56 = vsel %vm482_vm4, %v1189_v49, 0.0  ;;  %v1279_v30 = vsel %vm482_vm4, %v1275_v61, 0.0 }
 0x3bc   :  { %v1267_v4 = vadd.f32 %v1266_v56, %v1265_v7 }
 0x3bd   :  { %v1280_v8 = vsel %vm482_vm4, %v1276_v28, 0.0 }
 0x3be   :  { %v1281_v39 = vadd.f32 %v1280_v8, %v1279_v30 }
 0x3c4   :  { %v1258_v15 = vpop.f32.mrf.mxu1 }
 0x3c5   :  { %v1268_v33 = vsel %vm482_vm4, %v1258_v15, 0.0  ;;  %v1277_v34 = vmul.f32 %v1258_v15, %v1258_v15 }
 0x3c6   :  { %v1260_v42 = vpop.f32.mrf.mxu1  ;;  %v1269_v25 = vadd.f32 %v1268_v33, %v1267_v4 }
 0x3c7   :  { %v1270_v44 = vsel %vm482_vm4, %v1260_v42, 0.0  ;;  %v1278_v19 = vmul.f32 %v1260_v42, %v1260_v42  ;;  %v1282_v47 = vsel %vm482_vm4, %v1277_v34, 0.0 }
 0x3c8   :  { %v1271_v31 = vadd.f32 %v1270_v44, %v1269_v25  ;;  %v1283_v60 = vadd.f32 %v1282_v47, %v1281_v39 }
 0x3c9   :  { %v1284_v46 = vsel %vm482_vm4, %v1278_v19, 0.0 }
 0x3ca   :  { %1272 = vadd.xlane.f32.xlu0 %v1271_v31  ;;  %v1285_v48 = vadd.f32 %v1284_v46, %v1283_v60 }
 0x3cc   :  { %1286 = vadd.xlane.f32.xlu1 %v1285_v48 }
 0x3dd   :  { %1312 = vperm.xlu1 %1373, %v1264_v54  }
 0x3e0   :  { %1303 = vperm.xlu0 %1372, %v1263_v55  }
 0x453   :  { %v1273_v38 = vpop.xlane.xlu0 %1272 }
 0x454   :  { %v1274_v57 = vmul.f32 0.001953125, %v1273_v38 }
 0x455   :  { %v1287_v16 = vpop.xlane.xlu1 %1286 }
 0x456   :  { %v1288_v14 = vmul.f32 0.001953125, %v1287_v16  ;;  %v1289_v10 = vmul.f32 %v1274_v57, %v1274_v57  ;;  %v1291_v59 = vsub.f32 %v1187_v9, %v1274_v57  ;;  %v1292_v62 = vsub.f32 %v1189_v49, %v1274_v57 }
 0x457   :  { %v1293_v2 = vsub.f32 %v1258_v15, %v1274_v57  ;;  %v1294_v36 = vsub.f32 %v1260_v42, %v1274_v57 }
 0x458   :  { %v1290_v11 = vsub.f32 %v1288_v14, %v1289_v10 }
 0x459   :  { %v1313_v17 = vpop.permute.xlu1 %1312 }
 0x45a   :  { %v1295_v58 = vadd.f32 1e-05, %v1290_v11 }
 0x45b   :  { %v1304_v51 = vpop.permute.xlu0 %1303 }
 0x45c   :  { %1378 = vrsqrt.f32 %v1295_v58 }
 0x469   :  { %v1379_v63 = vpop.eup %1378 }
 0x46a   :  { %v1297_v35 = vmul.f32 %v1379_v63, %v1291_v59  ;;  %v1298_v3 = vmul.f32 %v1379_v63, %v1292_v62  ;;  %v1299_v45 = vmul.f32 %v1379_v63, %v1293_v2  ;;  %v1300_v5 = vmul.f32 %v1379_v63, %v1294_v36 }
 0x46c   :  { %v1306_v6 = vmul.f32 %v1304_v51, %v1297_v35  ;;  %v1307_v40 = vmul.f32 %v1304_v51, %v1298_v3  ;;  %v1308_v43 = vmul.f32 %v1304_v51, %v1299_v45  ;;  %v1309_v37 = vmul.f32 %v1304_v51, %v1300_v5 }
 0x46e   :  { %v1315_v20 = vadd.f32 %v1313_v17, %v1306_v6  ;;  %v1316_v32 = vadd.f32 %v1313_v17, %v1307_v40  ;;  %v1317_v29 = vadd.f32 %v1313_v17, %v1308_v43  ;;  %v1318_v21 = vadd.f32 %v1313_v17, %v1309_v37 }
 0x470   :  { %v1323_v22 = vcombine.low %v1315_v20, %v1316_v32  ;;  %v1324_v12 = vcombine.low %v1317_v29, %v1318_v21 }
 0x472   :  { %v1327_v13 = vadd.f32 %v1323_v22, %v1494_v1  ;;  %v1328_v24 = vadd.f32 %v1324_v12, %v1489_v0 }
 0x474   :  { %1329 = vst [vmem:[#allocation6] sm:$0xff] %v1327_v13  ;;  %1330 = vst [vmem:[#allocation6 + $0x8] sm:$0xff] %v1328_v24 }
 0x475   :  { %1411 = shalt.err (!%p1408_p9)
}
 0x476   :  { %1340 = dma.vmem_to_hbm [thread:$0]  %s1338_s7, 256, %s2019_s8, [#allocation5]  }
 0x477   :  { %1422 = dma.done.wait [#allocation5], 256  }
 0x478   :  { %1423 = vsyncadd [#allocation5], 4294967040 }
 0x479   :  { %1344 = vsyncpa [#allocation4], 1 }
 0x47a   :  { %1345 = vsyncpa [#allocation5], 1 }

</bundles_post_ra>
